<compile_context>
chip_gen: v7x
topology: tpu7x:2x2x1
jax: 0.10.0
libtpu: 0.0.40
codegen_flags: <defaults>
</compile_context>

<pallas_src>
import jax
import jax.numpy as jnp
from jax.experimental import pallas as pl
from jax.experimental.pallas import tpu as pltpu

F_DIM = 120   # feature size (attention dim)
SEG = 60      # rows per bag; L = cat([x1; x2], dim=1) has 2*SEG = 120 rows


# -----------------------------------------------------------------------------
# fused OURAttention kernel (single grid step; B unrolled in-kernel)
# -----------------------------------------------------------------------------
def our_attention_kernel(l_ref, lt_ref, wfc_ref, bfc_ref, wq_ref, bq_ref,
                         msel_ref, out_ref, att_ref):
    wfc = wfc_ref[...]                       # (C, F)  PyTorch Linear (out, in)
    bfc = bfc_ref[...]                       # (C, 1)
    wq = wq_ref[...]                         # (F, F)  stored as (in, out)
    bq = bq_ref[...]                         # (1, F)
    msel = msel_ref[...]                     # (4, 2C) summary selector
    B = l_ref.shape[0]
    C = wfc.shape[0]
    S2 = l_ref.shape[1]                      # 2 * SEG
    S = S2 // 2
    scale = 1.0 / jnp.sqrt(jnp.float32(wfc.shape[1]))
    neg = jnp.float32(-jnp.inf)

    col = jax.lax.broadcasted_iota(jnp.int32, (C, S2), 1)
    in_half1 = col < S

    # B is tiny (2); static unroll lets the scheduler interleave the two
    # independent per-batch matmul latency chains.
    for b in range(B):
        L = l_ref[b]                         # (2S, F)  rows [:S] = x1, [S:] = x2
        LT = lt_ref[b]                       # (F, 2S)

        # ---- select_class_max for x1 AND x2 with ONE fc matmul --------------
        scores = jnp.dot(wfc, LT, preferred_element_type=jnp.float32) + bfc  # (C, 2S)
        s1 = jnp.where(in_half1, scores, neg)
        s2 = jnp.where(in_half1, neg, scores)
        m1 = jnp.max(s1, axis=1, keepdims=True)
        m2 = jnp.max(s2, axis=1, keepdims=True)
        # first-argmax row per class (matches jnp.argmax / torch.sort[0]);
        # keep the fc-score matmul in f32 so the exact-equality trick holds.
        f1 = jnp.min(jnp.where(s1 == m1, col, S2), axis=1, keepdims=True)    # in [0, S)
        f2 = jnp.min(jnp.where(s2 == m2, col, S2), axis=1, keepdims=True)    # in [S, 2S)
        oh1 = (col == f1).astype(jnp.float32)                                # (C, 2S)
        oh2 = (col == f2).astype(jnp.float32)                                # (C, 2S)
        onehot = jnp.concatenate([oh1, oh2], axis=0)                         # (2C, 2S)
        h = jnp.dot(onehot, L, preferred_element_type=jnp.float32)           # (2C, F) = [h1; h2]

        # ---- q projection for both query stacks in ONE matmul ---------------
        # TODO(synk): Dropout layers in the reference have p=0.0 (identity) and
        # are omitted.
        q = jnp.dot(jnp.tanh(h), wq, preferred_element_type=jnp.float32) + bq  # (2C, F)

        # ---- both attention passes: ONE logits dot + ONE value dot ----------
        logits = jnp.dot(q, LT, preferred_element_type=jnp.float32) * scale    # (2C, 2S)
        m = jnp.max(logits, axis=1, keepdims=True)
        e = jnp.exp(logits - m)
        inv = pl.reciprocal(jnp.sum(e, axis=1, keepdims=True), approx=True)
        p = e * inv                                   # softmax over the 2S rows of L
        xo = jnp.dot(p, L, preferred_element_type=jnp.float32)                 # (2C, F)
        out_ref[b] = 0.9 * xo + 0.1 * q               # rows [:C] = x1_out, [C:] = x2_out

        # ---- six attention summaries as ONE lane-dense mask matmul ----------
        att_ref[b] = jnp.dot(msel, p, preferred_element_type=jnp.float32)      # (4, 2S)


def our_attention_forward(x1, x2, params):
    B, S, F = x1.shape
    wfc = params["wfc"]           # (C, F)  -- PyTorch Linear layout (out, in)
    C = wfc.shape[0]

    # L and L^T built once in the wrapper (fused into surrounding XLA) so every
    # in-kernel dot is in natural MXU orientation.
    L = jnp.concatenate([x1, x2], axis=1)             # (B, 2S, F)
    LT = jnp.swapaxes(L, 1, 2)                        # (B, F, 2S)

    # Summary selector: row0 -> A1 class 0, row1 -> A2 class 0,
    # row2 -> sum over A1 classes 1..C-1, row3 -> sum over A2 classes 1..C-1.
    msel = jnp.zeros((4, 2 * C), jnp.float32)
    msel = msel.at[0, 0].set(1.0)
    msel = msel.at[1, C].set(1.0)
    msel = msel.at[2, 1:C].set(1.0)
    msel = msel.at[3, C + 1:].set(1.0)

    def full_spec(shape):         # whole-array block, constant index_map
        nd = len(shape)
        return pl.BlockSpec(shape, lambda i: (0,) * nd)

    out, att = pl.pallas_call(
        our_attention_kernel,
        out_shape=(jax.ShapeDtypeStruct((B, 2 * C, F), jnp.float32),
                   jax.ShapeDtypeStruct((B, 4, 2 * S), jnp.float32)),
        grid=(1,),
        in_specs=[full_spec((B, 2 * S, F)),
                  full_spec((B, F, 2 * S)),
                  full_spec((C, F)), full_spec((C, 1)),
                  full_spec((F, F)), full_spec((1, F)),
                  full_spec((4, 2 * C))],
        out_specs=(full_spec((B, 2 * C, F)),
                   full_spec((B, 4, 2 * S))),
        compiler_params=pltpu.CompilerParams(
            dimension_semantics=("arbitrary",)),
    )(L, LT, wfc, params["bfc"].reshape(C, 1), params["wq"],
      params["bq"].reshape(1, F), msel)

    x1o = out[:, :C, :]
    x2o = out[:, C:, :]
    xx = jnp.concatenate([x1o, x2o], axis=2)          # torch.cat((x1, x2), dim=2)

    att1 = att[:, 0, :S, None]                        # ATT1  = A1[:, :60, :1]
    att2 = att[:, 1, S:, None]                        # ATT2  = A2[:, 60:, :1]
    att11 = att[:, 2, :S]                             # A1[:, :60, 1:].sum(2)
    att12 = att[:, 2, S:]                             # A1[:, 60:, 1:].sum(2)
    att22 = att[:, 3, S:]                             # A2[:, 60:, 1:].sum(2)
    att21 = att[:, 3, :S]                             # A2[:, :60, 1:].sum(2)
    return xx, att1, att2, att11, att22, att12, att21


# -----------------------------------------------------------------------------
# parameters + pure-JAX reference (for a tolerance check)
# -----------------------------------------------------------------------------
def init_params(key, num_classes):
    ks = jax.random.split(key, 4)

    def w(k, shape, scale=0.05):
        return (scale * jax.random.normal(k, shape)).astype(jnp.float32)

    return {
        # select_class_max.fc: Linear(120, C), PyTorch (out, in) layout + bias
        "wfc": w(ks[0], (num_classes, F_DIM)), "bfc": w(ks[1], (num_classes,)),
        # q: Linear(120, 120) stored here as (in, out) + bias
        # NOTE: porting trained torch weights requires transposing wq (torch is
        # (out, in)); wfc is already (out, in).
        "wq": w(ks[2], (F_DIM, F_DIM)), "bq": w(ks[3], (F_DIM,)),
    }


def reference_forward(x1, x2, params):
    # TODO(synk): dropout layers have p=0.0 (identity) and are omitted.
    wfc, bfc, wq, bq = params["wfc"], params["bfc"], params["wq"], params["bq"]
    S = x1.shape[1]
    scale = 1.0 / jnp.sqrt(jnp.float32(x1.shape[-1]))

    def selmax(x):
        out = jnp.einsum("bsf,cf->bsc", x, wfc) + bfc        # (B, S, C)
        onehot = jax.nn.one_hot(jnp.argmax(out, axis=1), S)  # (B, C, S) first-max row
        return jnp.einsum("bcs,bsf->bcf", onehot, x)         # (B, C, F)

    L = jnp.concatenate([x1, x2], axis=1)                    # (B, 2S, F)

    def attend(h):
        q = jnp.einsum("bcf,fg->bcg", jnp.tanh(h), wq) + bq
        A = jax.nn.softmax(jnp.einsum("bsf,bcf->bsc", L, q) * scale, axis=1)
        xo = jnp.einsum("bsc,bsf->bcf", A, L)
        return A, 0.9 * xo + 0.1 * q

    A1, x1o = attend(selmax(x1))
    A2, x2o = attend(selmax(x2))
    xx = jnp.concatenate([x1o, x2o], axis=2)
    return (xx, A1[:, :S, :1], A2[:, S:, :1],
            A1[:, :S, 1:].sum(axis=2), A2[:, S:, 1:].sum(axis=2),
            A1[:, S:, 1:].sum(axis=2), A2[:, :S, 1:].sum(axis=2))


if __name__ == "__main__":
    key = jax.random.PRNGKey(0)
    k1, k2, kp = jax.random.split(key, 3)

    num_classes = 5
    B = 2
    x1 = jax.random.normal(k1, (B, SEG, F_DIM), dtype=jnp.float32)
    x2 = jax.random.normal(k2, (B, SEG, F_DIM), dtype=jnp.float32)
    params = init_params(kp, num_classes)

    fwd = jax.jit(our_attention_forward)
    outs = fwd(x1, x2, params)
    jax.block_until_ready(outs)

    xx, att1, att2, att11, att22, att12, att21 = outs
    assert xx.shape == (B, num_classes, 2 * F_DIM)
    assert att1.shape == (B, SEG, 1) and att2.shape == (B, SEG, 1)
    assert att11.shape == (B, SEG) and att22.shape == (B, SEG)
    assert att12.shape == (B, SEG) and att21.shape == (B, SEG)

    refs = reference_forward(x1, x2, params)
    for name, got, want in zip(
            ("xx", "att1", "att2", "att11", "att22", "att12", "att21"),
            outs, refs):
        assert got.shape == want.shape, (name, got.shape, want.shape)
        assert jnp.allclose(got, want, rtol=5e-3, atol=1e-3), name

    print("KERNEL_OK")
</pallas_src>

<mosaic_0001>
module attributes {stable_mosaic.version = 11 : i64} {
  func.func @our_attention_kernel(%arg0: i32, %arg1: memref<2x120x120xf32, #tpu.memory_space<vmem>>, %arg2: memref<2x120x120xf32, #tpu.memory_space<vmem>>, %arg3: memref<5x120xf32, #tpu.memory_space<vmem>>, %arg4: memref<5x1xf32, #tpu.memory_space<vmem>>, %arg5: memref<120x120xf32, #tpu.memory_space<vmem>>, %arg6: memref<1x120xf32, #tpu.memory_space<vmem>>, %arg7: memref<4x10xf32, #tpu.memory_space<vmem>>, %arg8: memref<2x10x120xf32, #tpu.memory_space<vmem>>, %arg9: memref<2x4x120xf32, #tpu.memory_space<vmem>>) attributes {dimension_semantics = [#tpu.dimension_semantics<arbitrary>], iteration_bounds = array<i64: 1>, scalar_prefetch = 0 : i64, scratch_operands = 0 : i64, tpu.core_type = #tpu.core_type<tc>, window_params = [{pipeline_mode = #tpu.pipeline_mode<synchronous>, transform_indices = @transform_0, window_bounds = array<i64: 2, 120, 120>}, {pipeline_mode = #tpu.pipeline_mode<synchronous>, transform_indices = @transform_1, window_bounds = array<i64: 2, 120, 120>}, {pipeline_mode = #tpu.pipeline_mode<synchronous>, transform_indices = @transform_2, window_bounds = array<i64: 5, 120>}, {pipeline_mode = #tpu.pipeline_mode<synchronous>, transform_indices = @transform_3, window_bounds = array<i64: 5, 1>}, {pipeline_mode = #tpu.pipeline_mode<synchronous>, transform_indices = @transform_4, window_bounds = array<i64: 120, 120>}, {pipeline_mode = #tpu.pipeline_mode<synchronous>, transform_indices = @transform_5, window_bounds = array<i64: 1, 120>}, {pipeline_mode = #tpu.pipeline_mode<synchronous>, transform_indices = @transform_6, window_bounds = array<i64: 4, 10>}, {pipeline_mode = #tpu.pipeline_mode<synchronous>, transform_indices = @transform_7, window_bounds = array<i64: 2, 10, 120>}, {pipeline_mode = #tpu.pipeline_mode<synchronous>, transform_indices = @transform_8, window_bounds = array<i64: 2, 4, 120>}]} {
    %c0 = arith.constant 0 : index
    %c0_0 = arith.constant 0 : index
    %0 = vector.load %arg3[%c0, %c0_0] : memref<5x120xf32, #tpu.memory_space<vmem>>, vector<5x120xf32>
    %c0_1 = arith.constant 0 : index
    %c0_2 = arith.constant 0 : index
    %1 = vector.load %arg4[%c0_1, %c0_2] : memref<5x1xf32, #tpu.memory_space<vmem>>, vector<5x1xf32>
    %c0_3 = arith.constant 0 : index
    %c0_4 = arith.constant 0 : index
    %2 = vector.load %arg5[%c0_3, %c0_4] : memref<120x120xf32, #tpu.memory_space<vmem>>, vector<120x120xf32>
    %c0_5 = arith.constant 0 : index
    %c0_6 = arith.constant 0 : index
    %3 = vector.load %arg6[%c0_5, %c0_6] : memref<1x120xf32, #tpu.memory_space<vmem>>, vector<1x120xf32>
    %c0_7 = arith.constant 0 : index
    %c0_8 = arith.constant 0 : index
    %4 = vector.load %arg7[%c0_7, %c0_8] : memref<4x10xf32, #tpu.memory_space<vmem>>, vector<4x10xf32>
    %cst = arith.constant 1.200000e+02 : f32
    %5 = math.sqrt %cst : f32
    %cst_9 = arith.constant 1.000000e+00 : f32
    %6 = arith.divf %cst_9, %5 : f32
    %7 = tpu.iota {dimensions = array<i32: 1>} : vector<5x120xi32>
    %c60_i32 = arith.constant 60 : i32
    %8 = vector.broadcast %c60_i32 : i32 to vector<5x120xi32>
    %9 = arith.cmpi slt, %7, %8 : vector<5x120xi32>
    %c0_10 = arith.constant 0 : index
    %c0_11 = arith.constant 0 : index
    %c0_12 = arith.constant 0 : index
    %10 = vector.load %arg1[%c0_10, %c0_11, %c0_12] : memref<2x120x120xf32, #tpu.memory_space<vmem>>, vector<1x120x120xf32>
    %11 = vector.shape_cast %10 : vector<1x120x120xf32> to vector<120x120xf32>
    %c0_13 = arith.constant 0 : index
    %c0_14 = arith.constant 0 : index
    %c0_15 = arith.constant 0 : index
    %12 = vector.load %arg2[%c0_13, %c0_14, %c0_15] : memref<2x120x120xf32, #tpu.memory_space<vmem>>, vector<1x120x120xf32>
    %13 = vector.shape_cast %12 : vector<1x120x120xf32> to vector<120x120xf32>
    %cst_16 = arith.constant dense<0.000000e+00> : vector<5x120xf32>
    %14 = tpu.matmul %0, %13, %cst_16 {dimension_numbers = #tpu.dot_dimension_numbers<[1], [0], [0], [1], [0, 0, 1, 1], [], []>} : vector<5x120xf32>, vector<120x120xf32>, vector<5x120xf32> -> vector<5x120xf32>
    %15 = vector.broadcast %1 : vector<5x1xf32> to vector<5x120xf32>
    %16 = arith.addf %14, %15 : vector<5x120xf32>
    %cst_17 = arith.constant 0xFF800000 : f32
    %17 = vector.broadcast %cst_17 : f32 to vector<5x120xf32>
    %18 = arith.select %9, %16, %17 : vector<5x120xi1>, vector<5x120xf32>
    %cst_18 = arith.constant 0xFF800000 : f32
    %19 = vector.broadcast %cst_18 : f32 to vector<5x120xf32>
    %20 = arith.select %9, %19, %16 : vector<5x120xi1>, vector<5x120xf32>
    %cst_19 = arith.constant dense<0xFF800000> : vector<5xf32>
    %21 = vector.multi_reduction <maximumf>, %18, %cst_19 [1] : vector<5x120xf32> to vector<5xf32>
    %22 = vector.shape_cast %21 : vector<5xf32> to vector<5x1xf32>
    %cst_20 = arith.constant dense<0xFF800000> : vector<5xf32>
    %23 = vector.multi_reduction <maximumf>, %20, %cst_20 [1] : vector<5x120xf32> to vector<5xf32>
    %24 = vector.shape_cast %23 : vector<5xf32> to vector<5x1xf32>
    %25 = vector.broadcast %22 : vector<5x1xf32> to vector<5x120xf32>
    %26 = arith.cmpf oeq, %18, %25 : vector<5x120xf32>
    %c120_i32 = arith.constant 120 : i32
    %27 = vector.broadcast %c120_i32 : i32 to vector<5x120xi32>
    %28 = arith.select %26, %7, %27 : vector<5x120xi1>, vector<5x120xi32>
    %cst_21 = arith.constant dense<2147483647> : vector<5xi32>
    %29 = vector.multi_reduction <minsi>, %28, %cst_21 [1] : vector<5x120xi32> to vector<5xi32>
    %30 = vector.shape_cast %29 : vector<5xi32> to vector<5x1xi32>
    %31 = vector.broadcast %24 : vector<5x1xf32> to vector<5x120xf32>
    %32 = arith.cmpf oeq, %20, %31 : vector<5x120xf32>
    %c120_i32_22 = arith.constant 120 : i32
    %33 = vector.broadcast %c120_i32_22 : i32 to vector<5x120xi32>
    %34 = arith.select %32, %7, %33 : vector<5x120xi1>, vector<5x120xi32>
    %cst_23 = arith.constant dense<2147483647> : vector<5xi32>
    %35 = vector.multi_reduction <minsi>, %34, %cst_23 [1] : vector<5x120xi32> to vector<5xi32>
    %36 = vector.shape_cast %35 : vector<5xi32> to vector<5x1xi32>
    %37 = vector.broadcast %30 : vector<5x1xi32> to vector<5x120xi32>
    %38 = arith.cmpi eq, %7, %37 : vector<5x120xi32>
    %39 = arith.extui %38 : vector<5x120xi1> to vector<5x120xi32>
    %40 = arith.sitofp %39 : vector<5x120xi32> to vector<5x120xf32>
    %41 = vector.broadcast %36 : vector<5x1xi32> to vector<5x120xi32>
    %42 = arith.cmpi eq, %7, %41 : vector<5x120xi32>
    %43 = arith.extui %42 : vector<5x120xi1> to vector<5x120xi32>
    %44 = arith.sitofp %43 : vector<5x120xi32> to vector<5x120xf32>
    %45 = tpu.concatenate %40, %44 in 0 : vector<5x120xf32>, vector<5x120xf32> -> vector<10x120xf32>
    %cst_24 = arith.constant dense<0.000000e+00> : vector<10x120xf32>
    %46 = tpu.matmul %45, %11, %cst_24 {dimension_numbers = #tpu.dot_dimension_numbers<[1], [0], [0], [1], [0, 0, 1, 1], [], []>} : vector<10x120xf32>, vector<120x120xf32>, vector<10x120xf32> -> vector<10x120xf32>
    %47 = math.tanh %46 : vector<10x120xf32>
    %cst_25 = arith.constant dense<0.000000e+00> : vector<10x120xf32>
    %48 = tpu.matmul %47, %2, %cst_25 {dimension_numbers = #tpu.dot_dimension_numbers<[1], [0], [0], [1], [0, 0, 1, 1], [], []>} : vector<10x120xf32>, vector<120x120xf32>, vector<10x120xf32> -> vector<10x120xf32>
    %49 = vector.broadcast %3 : vector<1x120xf32> to vector<10x120xf32>
    %50 = arith.addf %48, %49 : vector<10x120xf32>
    %cst_26 = arith.constant dense<0.000000e+00> : vector<10x120xf32>
    %51 = tpu.matmul %50, %13, %cst_26 {dimension_numbers = #tpu.dot_dimension_numbers<[1], [0], [0], [1], [0, 0, 1, 1], [], []>} : vector<10x120xf32>, vector<120x120xf32>, vector<10x120xf32> -> vector<10x120xf32>
    %52 = vector.broadcast %6 : f32 to vector<10x120xf32>
    %53 = arith.mulf %51, %52 : vector<10x120xf32>
    %cst_27 = arith.constant dense<0xFF800000> : vector<10xf32>
    %54 = vector.multi_reduction <maximumf>, %53, %cst_27 [1] : vector<10x120xf32> to vector<10xf32>
    %55 = vector.shape_cast %54 : vector<10xf32> to vector<10x1xf32>
    %56 = vector.broadcast %55 : vector<10x1xf32> to vector<10x120xf32>
    %57 = arith.subf %53, %56 : vector<10x120xf32>
    %58 = math.exp %57 : vector<10x120xf32>
    %cst_28 = arith.constant dense<0.000000e+00> : vector<10xf32>
    %59 = vector.multi_reduction <add>, %58, %cst_28 [1] : vector<10x120xf32> to vector<10xf32>
    %60 = vector.shape_cast %59 : vector<10xf32> to vector<10x1xf32>
    %61 = tpu.reciprocal %60 {approx = true} : vector<10x1xf32> -> vector<10x1xf32>
    %62 = vector.broadcast %61 : vector<10x1xf32> to vector<10x120xf32>
    %63 = arith.mulf %58, %62 : vector<10x120xf32>
    %cst_29 = arith.constant dense<0.000000e+00> : vector<10x120xf32>
    %64 = tpu.matmul %63, %11, %cst_29 {dimension_numbers = #tpu.dot_dimension_numbers<[1], [0], [0], [1], [0, 0, 1, 1], [], []>} : vector<10x120xf32>, vector<120x120xf32>, vector<10x120xf32> -> vector<10x120xf32>
    %cst_30 = arith.constant 0.899999976 : f32
    %65 = vector.broadcast %cst_30 : f32 to vector<10x120xf32>
    %66 = arith.mulf %65, %64 : vector<10x120xf32>
    %cst_31 = arith.constant 1.000000e-01 : f32
    %67 = vector.broadcast %cst_31 : f32 to vector<10x120xf32>
    %68 = arith.mulf %67, %50 : vector<10x120xf32>
    %69 = arith.addf %66, %68 : vector<10x120xf32>
    %c0_32 = arith.constant 0 : index
    %c0_33 = arith.constant 0 : index
    %c0_34 = arith.constant 0 : index
    %70 = vector.load %arg8[%c0_32, %c0_33, %c0_34] : memref<2x10x120xf32, #tpu.memory_space<vmem>>, vector<1x10x120xf32>
    %71 = vector.shape_cast %70 : vector<1x10x120xf32> to vector<10x120xf32>
    %72 = vector.shape_cast %69 : vector<10x120xf32> to vector<1x10x120xf32>
    tpu.vector_store %arg8[%c0_32, %c0_33, %c0_34], %72 {strides = array<i32>} : memref<2x10x120xf32, #tpu.memory_space<vmem>>, vector<1x10x120xf32>,
    %cst_35 = arith.constant dense<0.000000e+00> : vector<4x120xf32>
    %73 = tpu.matmul %4, %63, %cst_35 {dimension_numbers = #tpu.dot_dimension_numbers<[1], [0], [0], [1], [0, 0, 1, 1], [], []>} : vector<4x10xf32>, vector<10x120xf32>, vector<4x120xf32> -> vector<4x120xf32>
    %c0_36 = arith.constant 0 : index
    %c0_37 = arith.constant 0 : index
    %c0_38 = arith.constant 0 : index
    %74 = vector.load %arg9[%c0_36, %c0_37, %c0_38] : memref<2x4x120xf32, #tpu.memory_space<vmem>>, vector<1x4x120xf32>
    %75 = vector.shape_cast %74 : vector<1x4x120xf32> to vector<4x120xf32>
    %76 = vector.shape_cast %73 : vector<4x120xf32> to vector<1x4x120xf32>
    tpu.vector_store %arg9[%c0_36, %c0_37, %c0_38], %76 {strides = array<i32>} : memref<2x4x120xf32, #tpu.memory_space<vmem>>, vector<1x4x120xf32>,
    %c1 = arith.constant 1 : index
    %c0_39 = arith.constant 0 : index
    %c0_40 = arith.constant 0 : index
    %77 = vector.load %arg1[%c1, %c0_39, %c0_40] : memref<2x120x120xf32, #tpu.memory_space<vmem>>, vector<1x120x120xf32>
    %78 = vector.shape_cast %77 : vector<1x120x120xf32> to vector<120x120xf32>
    %c1_41 = arith.constant 1 : index
    %c0_42 = arith.constant 0 : index
    %c0_43 = arith.constant 0 : index
    %79 = vector.load %arg2[%c1_41, %c0_42, %c0_43] : memref<2x120x120xf32, #tpu.memory_space<vmem>>, vector<1x120x120xf32>
    %80 = vector.shape_cast %79 : vector<1x120x120xf32> to vector<120x120xf32>
    %cst_44 = arith.constant dense<0.000000e+00> : vector<5x120xf32>
    %81 = tpu.matmul %0, %80, %cst_44 {dimension_numbers = #tpu.dot_dimension_numbers<[1], [0], [0], [1], [0, 0, 1, 1], [], []>} : vector<5x120xf32>, vector<120x120xf32>, vector<5x120xf32> -> vector<5x120xf32>
    %82 = vector.broadcast %1 : vector<5x1xf32> to vector<5x120xf32>
    %83 = arith.addf %81, %82 : vector<5x120xf32>
    %cst_45 = arith.constant 0xFF800000 : f32
    %84 = vector.broadcast %cst_45 : f32 to vector<5x120xf32>
    %85 = arith.select %9, %83, %84 : vector<5x120xi1>, vector<5x120xf32>
    %cst_46 = arith.constant 0xFF800000 : f32
    %86 = vector.broadcast %cst_46 : f32 to vector<5x120xf32>
    %87 = arith.select %9, %86, %83 : vector<5x120xi1>, vector<5x120xf32>
    %cst_47 = arith.constant dense<0xFF800000> : vector<5xf32>
    %88 = vector.multi_reduction <maximumf>, %85, %cst_47 [1] : vector<5x120xf32> to vector<5xf32>
    %89 = vector.shape_cast %88 : vector<5xf32> to vector<5x1xf32>
    %cst_48 = arith.constant dense<0xFF800000> : vector<5xf32>
    %90 = vector.multi_reduction <maximumf>, %87, %cst_48 [1] : vector<5x120xf32> to vector<5xf32>
    %91 = vector.shape_cast %90 : vector<5xf32> to vector<5x1xf32>
    %92 = vector.broadcast %89 : vector<5x1xf32> to vector<5x120xf32>
    %93 = arith.cmpf oeq, %85, %92 : vector<5x120xf32>
    %c120_i32_49 = arith.constant 120 : i32
    %94 = vector.broadcast %c120_i32_49 : i32 to vector<5x120xi32>
    %95 = arith.select %93, %7, %94 : vector<5x120xi1>, vector<5x120xi32>
    %cst_50 = arith.constant dense<2147483647> : vector<5xi32>
    %96 = vector.multi_reduction <minsi>, %95, %cst_50 [1] : vector<5x120xi32> to vector<5xi32>
    %97 = vector.shape_cast %96 : vector<5xi32> to vector<5x1xi32>
    %98 = vector.broadcast %91 : vector<5x1xf32> to vector<5x120xf32>
    %99 = arith.cmpf oeq, %87, %98 : vector<5x120xf32>
    %c120_i32_51 = arith.constant 120 : i32
    %100 = vector.broadcast %c120_i32_51 : i32 to vector<5x120xi32>
    %101 = arith.select %99, %7, %100 : vector<5x120xi1>, vector<5x120xi32>
    %cst_52 = arith.constant dense<2147483647> : vector<5xi32>
    %102 = vector.multi_reduction <minsi>, %101, %cst_52 [1] : vector<5x120xi32> to vector<5xi32>
    %103 = vector.shape_cast %102 : vector<5xi32> to vector<5x1xi32>
    %104 = vector.broadcast %97 : vector<5x1xi32> to vector<5x120xi32>
    %105 = arith.cmpi eq, %7, %104 : vector<5x120xi32>
    %106 = arith.extui %105 : vector<5x120xi1> to vector<5x120xi32>
    %107 = arith.sitofp %106 : vector<5x120xi32> to vector<5x120xf32>
    %108 = vector.broadcast %103 : vector<5x1xi32> to vector<5x120xi32>
    %109 = arith.cmpi eq, %7, %108 : vector<5x120xi32>
    %110 = arith.extui %109 : vector<5x120xi1> to vector<5x120xi32>
    %111 = arith.sitofp %110 : vector<5x120xi32> to vector<5x120xf32>
    %112 = tpu.concatenate %107, %111 in 0 : vector<5x120xf32>, vector<5x120xf32> -> vector<10x120xf32>
    %cst_53 = arith.constant dense<0.000000e+00> : vector<10x120xf32>
    %113 = tpu.matmul %112, %78, %cst_53 {dimension_numbers = #tpu.dot_dimension_numbers<[1], [0], [0], [1], [0, 0, 1, 1], [], []>} : vector<10x120xf32>, vector<120x120xf32>, vector<10x120xf32> -> vector<10x120xf32>
    %114 = math.tanh %113 : vector<10x120xf32>
    %cst_54 = arith.constant dense<0.000000e+00> : vector<10x120xf32>
    %115 = tpu.matmul %114, %2, %cst_54 {dimension_numbers = #tpu.dot_dimension_numbers<[1], [0], [0], [1], [0, 0, 1, 1], [], []>} : vector<10x120xf32>, vector<120x120xf32>, vector<10x120xf32> -> vector<10x120xf32>
    %116 = vector.broadcast %3 : vector<1x120xf32> to vector<10x120xf32>
    %117 = arith.addf %115, %116 : vector<10x120xf32>
    %cst_55 = arith.constant dense<0.000000e+00> : vector<10x120xf32>
    %118 = tpu.matmul %117, %80, %cst_55 {dimension_numbers = #tpu.dot_dimension_numbers<[1], [0], [0], [1], [0, 0, 1, 1], [], []>} : vector<10x120xf32>, vector<120x120xf32>, vector<10x120xf32> -> vector<10x120xf32>
    %119 = vector.broadcast %6 : f32 to vector<10x120xf32>
    %120 = arith.mulf %118, %119 : vector<10x120xf32>
    %cst_56 = arith.constant dense<0xFF800000> : vector<10xf32>
    %121 = vector.multi_reduction <maximumf>, %120, %cst_56 [1] : vector<10x120xf32> to vector<10xf32>
    %122 = vector.shape_cast %121 : vector<10xf32> to vector<10x1xf32>
    %123 = vector.broadcast %122 : vector<10x1xf32> to vector<10x120xf32>
    %124 = arith.subf %120, %123 : vector<10x120xf32>
    %125 = math.exp %124 : vector<10x120xf32>
    %cst_57 = arith.constant dense<0.000000e+00> : vector<10xf32>
    %126 = vector.multi_reduction <add>, %125, %cst_57 [1] : vector<10x120xf32> to vector<10xf32>
    %127 = vector.shape_cast %126 : vector<10xf32> to vector<10x1xf32>
    %128 = tpu.reciprocal %127 {approx = true} : vector<10x1xf32> -> vector<10x1xf32>
    %129 = vector.broadcast %128 : vector<10x1xf32> to vector<10x120xf32>
    %130 = arith.mulf %125, %129 : vector<10x120xf32>
    %cst_58 = arith.constant dense<0.000000e+00> : vector<10x120xf32>
    %131 = tpu.matmul %130, %78, %cst_58 {dimension_numbers = #tpu.dot_dimension_numbers<[1], [0], [0], [1], [0, 0, 1, 1], [], []>} : vector<10x120xf32>, vector<120x120xf32>, vector<10x120xf32> -> vector<10x120xf32>
    %cst_59 = arith.constant 0.899999976 : f32
    %132 = vector.broadcast %cst_59 : f32 to vector<10x120xf32>
    %133 = arith.mulf %132, %131 : vector<10x120xf32>
    %cst_60 = arith.constant 1.000000e-01 : f32
    %134 = vector.broadcast %cst_60 : f32 to vector<10x120xf32>
    %135 = arith.mulf %134, %117 : vector<10x120xf32>
    %136 = arith.addf %133, %135 : vector<10x120xf32>
    %c1_61 = arith.constant 1 : index
    %c0_62 = arith.constant 0 : index
    %c0_63 = arith.constant 0 : index
    %137 = vector.load %arg8[%c1_61, %c0_62, %c0_63] : memref<2x10x120xf32, #tpu.memory_space<vmem>>, vector<1x10x120xf32>
    %138 = vector.shape_cast %137 : vector<1x10x120xf32> to vector<10x120xf32>
    %139 = vector.shape_cast %136 : vector<10x120xf32> to vector<1x10x120xf32>
    tpu.vector_store %arg8[%c1_61, %c0_62, %c0_63], %139 {strides = array<i32>} : memref<2x10x120xf32, #tpu.memory_space<vmem>>, vector<1x10x120xf32>,
    %cst_64 = arith.constant dense<0.000000e+00> : vector<4x120xf32>
    %140 = tpu.matmul %4, %130, %cst_64 {dimension_numbers = #tpu.dot_dimension_numbers<[1], [0], [0], [1], [0, 0, 1, 1], [], []>} : vector<4x10xf32>, vector<10x120xf32>, vector<4x120xf32> -> vector<4x120xf32>
    %c1_65 = arith.constant 1 : index
    %c0_66 = arith.constant 0 : index
    %c0_67 = arith.constant 0 : index
    %141 = vector.load %arg9[%c1_65, %c0_66, %c0_67] : memref<2x4x120xf32, #tpu.memory_space<vmem>>, vector<1x4x120xf32>
    %142 = vector.shape_cast %141 : vector<1x4x120xf32> to vector<4x120xf32>
    %143 = vector.shape_cast %140 : vector<4x120xf32> to vector<1x4x120xf32>
    tpu.vector_store %arg9[%c1_65, %c0_66, %c0_67], %143 {strides = array<i32>} : memref<2x4x120xf32, #tpu.memory_space<vmem>>, vector<1x4x120xf32>,
    return
  }
  func.func @transform_0(%arg0: i32) -> (i32, i32, i32) {
    %c0_i32 = arith.constant 0 : i32
    %c0_i32_0 = arith.constant 0 : i32
    %c0_i32_1 = arith.constant 0 : i32
    %c0_i32_2 = arith.constant 0 : i32
    return %c0_i32, %c0_i32_0, %c0_i32_1 : i32, i32, i32
  }
  func.func @transform_1(%arg0: i32) -> (i32, i32, i32) {
    %c0_i32 = arith.constant 0 : i32
    %c0_i32_0 = arith.constant 0 : i32
    %c0_i32_1 = arith.constant 0 : i32
    %c0_i32_2 = arith.constant 0 : i32
    return %c0_i32, %c0_i32_0, %c0_i32_1 : i32, i32, i32
  }
  func.func @transform_2(%arg0: i32) -> (i32, i32) {
    %c0_i32 = arith.constant 0 : i32
    %c0_i32_0 = arith.constant 0 : i32
    %c0_i32_1 = arith.constant 0 : i32
    return %c0_i32, %c0_i32_0 : i32, i32
  }
  func.func @transform_3(%arg0: i32) -> (i32, i32) {
    %c0_i32 = arith.constant 0 : i32
    %c0_i32_0 = arith.constant 0 : i32
    %c0_i32_1 = arith.constant 0 : i32
    return %c0_i32, %c0_i32_0 : i32, i32
  }
  func.func @transform_4(%arg0: i32) -> (i32, i32) {
    %c0_i32 = arith.constant 0 : i32
    %c0_i32_0 = arith.constant 0 : i32
    %c0_i32_1 = arith.constant 0 : i32
    return %c0_i32, %c0_i32_0 : i32, i32
  }
  func.func @transform_5(%arg0: i32) -> (i32, i32) {
    %c0_i32 = arith.constant 0 : i32
    %c0_i32_0 = arith.constant 0 : i32
    %c0_i32_1 = arith.constant 0 : i32
    return %c0_i32, %c0_i32_0 : i32, i32
  }
  func.func @transform_6(%arg0: i32) -> (i32, i32) {
    %c0_i32 = arith.constant 0 : i32
    %c0_i32_0 = arith.constant 0 : i32
    %c0_i32_1 = arith.constant 0 : i32
    return %c0_i32, %c0_i32_0 : i32, i32
  }
  func.func @transform_7(%arg0: i32) -> (i32, i32, i32) {
    %c0_i32 = arith.constant 0 : i32
    %c0_i32_0 = arith.constant 0 : i32
    %c0_i32_1 = arith.constant 0 : i32
    %c0_i32_2 = arith.constant 0 : i32
    return %c0_i32, %c0_i32_0, %c0_i32_1 : i32, i32, i32
  }
  func.func @transform_8(%arg0: i32) -> (i32, i32, i32) {
    %c0_i32 = arith.constant 0 : i32
    %c0_i32_0 = arith.constant 0 : i32
    %c0_i32_1 = arith.constant 0 : i32
    %c0_i32_2 = arith.constant 0 : i32
    return %c0_i32, %c0_i32_0, %c0_i32_1 : i32, i32, i32
  }
}

</mosaic_0001>

<bundles_post_ra>
// kernel: our_attention_forward.1
= control target key start
LH: loop header
LB: loop body
LE: loop exit
PB: predicated region body
PF: predicated region fallthrough
CT: control target
= control target key end

     0   :  { %v2132_v0 = vmov 0.0|0.0   ;;  %vm2133_vm0 = vmmov 0   ;;  %v2134_v4 = vmov 0.0   ;;  %v2135_v7 = vmov 0   ;;  %s2776_s1 = inlined_call_operand.vmem [shape: f32[2,120,120], index: 1, kind: input, shape index: {}]   ;;  %s2777_s3 = inlined_call_operand.vmem [shape: f32[5,1], index: 3, kind: input, shape index: {}]   ;;  %s2778_s2 = inlined_call_operand.vmem [shape: f32[5,120], index: 2, kind: input, shape index: {}]   ;;  %s2779_s0 = inlined_call_operand.vmem [shape: f32[2,120,120], index: 0, kind: input, shape index: {}]   ;;  %s2780_s4 = inlined_call_operand.vmem [shape: f32[120,120], index: 4, kind: input, shape index: {}]   ;;  %s2781_s5 = inlined_call_operand.vmem [shape: f32[1,120], index: 5, kind: input, shape index: {}]   ;;  %s2782_s6 = inlined_call_operand.vmem [shape: f32[4,10], index: 6, kind: input, shape index: {}]   ;;  %s2783_s7 = inlined_call_operand.vmem [shape: f32[2,10,120], index: 7, kind: output, shape index: {0}]   ;;  %s2784_s8 = inlined_call_operand.vmem [shape: f32[2,4,120], index: 8, kind: output, shape index: {1}]  }
   0x1   :  { %1828 = vmatprep.subr.bf16.mxu0 %v2132_v0  ;;  %v65_v1 = vld [vmem:[%s2776_s1] sm:$0xff]  ;;  %v66_v2 = vld [vmem:[%s2776_s1 + $0x8] sm:$0xff]  ;;  %v67_v3 = vld [vmem:[%s2776_s1 + $0x10] sm:$0xff]  ;;  %1514 = vmatprep.mubr.msk.f32.mxu0 %vm2133_vm0, %v2134_v4  ;;  %vm85_vm1 = vcmask 982016   ;;  %v47_v27 = vlaneseq  ;;  %vm161_vm3 = vcmask 978944   ;;  %vm211_vm9 = vcmask 1044480  }
   0x2   :  { %v2194_v5 = vpack.c.bf16 %v66_v2, %v65_v1  ;;  %v68_v6 = vld [vmem:[%s2776_s1 + $0x18] sm:$0xff]  ;;  %2107 = vset.pattern.permute.xlu0 %v2135_v7  ;;  %v69_v9 = vld [vmem:[%s2776_s1 + $0x20] sm:$0xff]  ;;  %v70_v10 = vld [vmem:[%s2776_s1 + $0x28] sm:$0xff]  ;;  %vm468_vm11 = vcmask 975872   ;;  %vm581_vm12 = vcmask 1041408   ;;  %vm2136_vm13 = vmmov 1  }
   0x3   :  { %v2200_v8 = vpack.c.bf16 %v68_v6, %v67_v3  ;;  %v29_v11 = vld [vmem:[%s2777_s3] sm:$0x1f]  ;;  %v2213_v12 = vpack.c.bf16 %v70_v10, %v69_v9  ;;  %v71_v13 = vld [vmem:[%s2776_s1 + $0x30] sm:$0xff]  ;;  %v72_v14 = vld [vmem:[%s2776_s1 + $0x38] sm:$0xff]  ;;  %v2271_v28 = vand.u32 127, %v47_v27  ;;  %vm577_vm15 = vcmask 80896  }
   0x4   :  { %1830 = vmatpush3.bf16.msra.mxu0 %v2194_v5  ;;  %82 = vperm.xlu0 %2107, %v29_v11   ;;  %v2223_v15 = vpack.c.bf16 %v72_v14, %v71_v13  ;;  %v73_v16 = vld [vmem:[%s2776_s1 + $0x40] sm:$0xff]  ;;  %v74_v17 = vld [vmem:[%s2776_s1 + $0x48] sm:$0xff]  ;;  %v75_v19 = vld [vmem:[%s2776_s1 + $0x50] sm:$0xff] }
   0x5   :  { %1831 = vmatprep.subr.bf16.mxu0 %v2132_v0  ;;  %v2233_v18 = vpack.c.bf16 %v74_v17, %v73_v16  ;;  %v76_v20 = vld [vmem:[%s2776_s1 + $0x58] sm:$0xff]  ;;  %v77_v22 = vld [vmem:[%s2776_s1 + $0x60] sm:$0xff]  ;;  %v78_v23 = vld [vmem:[%s2776_s1 + $0x68] sm:$0xff]  ;;  %vm49_vm2 = vcmp.lt.s32.totalorder %v2271_v28, 60 }
   0x6   :  { %v2243_v21 = vpack.c.bf16 %v76_v20, %v75_v19  ;;  %v2253_v24 = vpack.c.bf16 %v78_v23, %v77_v22  ;;  %v2261_v25 = vld [vmem:[%s2776_s1 + $0x70] sm:$0xff]  ;;  %v2266_v26 = vld [vmem:[%s2778_s2] sm:$0x1f]  ;;  %v51_v48 = vld [vmem:[%s2779_s0 + $0x8] sm:$0xff] }
   0x7   :  { %v50_v47 = vld [vmem:[%s2779_s0] sm:$0xff]  ;;  %v52_v49 = vld [vmem:[%s2779_s0 + $0x10] sm:$0xff]  ;;  %v53_v51 = vld [vmem:[%s2779_s0 + $0x18] sm:$0xff] }
   0x8   :  { %1833 = vmatpush3.bf16.msra.mxu0 %v2200_v8  ;;  %v2296_v50 = vpack.c.bf16 %v51_v48, %v50_v47  ;;  %v2301_v52 = vpack.c.bf16 %v53_v51, %v52_v49  ;;  %v54_v53 = vld [vmem:[%s2779_s0 + $0x20] sm:$0xff]  ;;  %v55_v54 = vld [vmem:[%s2779_s0 + $0x28] sm:$0xff]  ;;  %v56_v56 = vld [vmem:[%s2779_s0 + $0x30] sm:$0xff] }
   0x9   :  { %1834 = vmatprep.subr.bf16.mxu0 %v2132_v0  ;;  %v2312_v55 = vpack.c.bf16 %v55_v54, %v54_v53  ;;  %v57_v57 = vld [vmem:[%s2779_s0 + $0x38] sm:$0xff]  ;;  %v58_v59 = vld [vmem:[%s2779_s0 + $0x40] sm:$0xff]  ;;  %v59_v60 = vld [vmem:[%s2779_s0 + $0x48] sm:$0xff] }
   0xa   :  { %1850 = vmatprep.subr.bf16.mxu1 %v2296_v50  ;;  %v2322_v58 = vpack.c.bf16 %v57_v57, %v56_v56  ;;  %v2332_v61 = vpack.c.bf16 %v59_v60, %v58_v59  ;;  %v60_v10 = vld [vmem:[%s2779_s0 + $0x50] sm:$0xff]  ;;  %v61_v11 = vld [vmem:[%s2779_s0 + $0x58] sm:$0xff]  ;;  %v62_v14 = vld [vmem:[%s2779_s0 + $0x60] sm:$0xff] }
   0xb   :  { %1852 = vmatpush3.bf16.msra.mxu1 %v2296_v50  ;;  %v2343_v13 = vpack.c.bf16 %v61_v11, %v60_v10  ;;  %v63_v16 = vld [vmem:[%s2779_s0 + $0x68] sm:$0xff]  ;;  %v2359_v19 = vld [vmem:[%s2779_s0 + $0x70] sm:$0xff]  ;;  %v30_v20 = vld [vmem:[%s2780_s4] sm:$0xff] }
   0xc   :  { %1836 = vmatpush3.bf16.msra.mxu0 %v2213_v12  ;;  %1854 = vmatprep.subr.bf16.mxu1 %v2301_v52  ;;  %v2353_v17 = vpack.c.bf16 %v63_v16, %v62_v14  ;;  %v31_v22 = vld [vmem:[%s2780_s4 + $0x8] sm:$0xff]  ;;  %v32_v23 = vld [vmem:[%s2780_s4 + $0x10] sm:$0xff]  ;;  %vm2505_vm14 = vmpackc.low %vm581_vm12, %vm2136_vm13 }
   0xd   :  { %1837 = vmatprep.subr.bf16.mxu0 %v2132_v0  ;;  %v2374_v27 = vpack.c.bf16 %v31_v22, %v30_v20  ;;  %v2460_v56 = vld [vmem:[%s2780_s4 + $0x70] sm:$0xff] }
   0xf   :  { %1856 = vmatpush3.bf16.msra.mxu1 %v2301_v52 }
  0x10   :  { %1839 = vmatpush3.bf16.msra.mxu0 %v2223_v15  ;;  %1858 = vmatprep.subr.bf16.mxu1 %v2312_v55 }
  0x11   :  { %1840 = vmatprep.subr.bf16.mxu0 %v2132_v0 }
  0x13   :  { %1860 = vmatpush3.bf16.msra.mxu1 %v2312_v55 }
  0x14   :  { %1842 = vmatpush3.bf16.msra.mxu0 %v2233_v18  ;;  %1862 = vmatprep.subr.bf16.mxu1 %v2322_v58 }
  0x15   :  { %1843 = vmatprep.subr.bf16.mxu0 %v2132_v0 }
  0x17   :  { %1864 = vmatpush3.bf16.msra.mxu1 %v2322_v58 }
  0x18   :  { %1845 = vmatpush3.bf16.msra.mxu0 %v2243_v21  ;;  %1866 = vmatprep.subr.bf16.mxu1 %v2332_v61 }
  0x19   :  { %1846 = vmatprep.subr.bf16.mxu0 %v2132_v0 }
  0x1b   :  { %1868 = vmatpush3.bf16.msra.mxu1 %v2332_v61 }
  0x1c   :  { %1848 = vmatpush3.bf16.msra.mxu0 %v2253_v24  ;;  %1870 = vmatprep.subr.bf16.mxu1 %v2343_v13 }
  0x1d   :  { %1512 = vmatprep.subr.mxu0 %v2134_v4 }
  0x1f   :  { %1872 = vmatpush3.bf16.msra.mxu1 %v2343_v13 }
  0x20   :  { %1513 = vmatpush3.msra.mxu0 %v2261_v25  ;;  %1874 = vmatprep.subr.bf16.mxu1 %v2353_v17 }
  0x21   :  { %1515 = vmatmul.mubr.msk.f32.vlgmr.msra.gmra.mrb[0].mxu0 %vm85_vm1, %v2266_v26  ;;  %1878 = vmatprep.subr.bf16.mxu0 %v2374_v27 }
  0x22   :  { %1880 = vmatpush3.bf16.msra.mxu0 %v2374_v27 }
  0x23   :  { %1876 = vmatpush3.bf16.msra.mxu1 %v2353_v17 }
  0x24   :  { %1545 = vmatprep.subr.mxu1 %v2359_v19 }
  0x27   :  { %1546 = vmatpush3.msra.mxu1 %v2359_v19 }
  0x28   :  { %1906 = vmatprep.subr.bf16.mxu1 %v2194_v5 }
  0x83   :  { %v2273_v29 = vpop.permute.xlu0 %82 }
  0xf4   :  { %v155_v30 = vpop.f32.mrb[0].mxu0 }
  0xf5   :  { %v156_v31 = vadd.f32 %v155_v30, %v2273_v29  ;;  %v1516_v32 = vpop.f32.mrb[1].mxu0  ;;  %v33_v30 = vld [vmem:[%s2780_s4 + $0x18] sm:$0xff] }
  0xf6   :  { %v34_v32 = vld [vmem:[%s2780_s4 + $0x20] sm:$0xff] }
  0xf7   :  { %v160_v33 = vsel %vm49_vm2, -inf, %v156_v31  ;;  %v159_v34 = vsel %vm49_vm2, %v156_v31, -inf  ;;  %v2379_v31 = vpack.c.bf16 %v33_v30, %v32_v23 }
  0xf8   :  { %v165_v35 = vsel %vm161_vm3, %v160_v33, -inf  ;;  %v162_v36 = vsel %vm161_vm3, %v159_v34, -inf }
  0xf9   :  { %166 = vmax.xlane.f32.xlu0 %v165_v35  ;;  %163 = vmax.xlane.f32.xlu1 %v162_v36  ;;  %v36_v35 = vld [vmem:[%s2780_s4 + $0x30] sm:$0xff]  ;;  %v37_v36 = vld [vmem:[%s2780_s4 + $0x38] sm:$0xff] }
  0xfa   :  { %1882 = vmatprep.subr.bf16.mxu0 %v2379_v31 }
  0xfb   :  { %1884 = vmatpush3.bf16.msra.mxu0 %v2379_v31 }
 0x186   :  { %v167_v37 = vpop.xlane.xlu0 %166  ;;  %v164_v38 = vpop.xlane.xlu1 %163 }
 0x187   :  { %vm185_vm4 = vcmp.eq.f32.partialorder %v160_v33, %v167_v37  ;;  %vm168_vm5 = vcmp.eq.f32.partialorder %v159_v34, %v164_v38  ;;  %v35_v33 = vld [vmem:[%s2780_s4 + $0x28] sm:$0xff]  ;;  %v2400_v37 = vpack.c.bf16 %v37_v36, %v36_v35 }
 0x188   :  { %v186_v39 = vsel %vm185_vm4, %v2271_v28, 120  ;;  %v169_v40 = vsel %vm168_vm5, %v2271_v28, 120  ;;  %v2390_v34 = vpack.c.bf16 %v35_v33, %v34_v32  ;;  %vm654_vm4 = vcmask 977920  }
 0x189   :  { %v187_v41 = vsel %vm161_vm3, %v186_v39, 2147483647  ;;  %v170_v42 = vsel %vm161_vm3, %v169_v40, 2147483647 }
 0x18a   :  { %v189_v43 = vshra.s32 %v187_v41, 16  ;;  %v172_v45 = vshra.s32 %v170_v42, 16  ;;  %v188_v62 = vand.u32 65535, %v187_v41  ;;  %v171_v2 = vand.u32 65535, %v170_v42  ;;  %1886 = vmatprep.subr.bf16.mxu0 %v2390_v34 }
 0x18b   :  { %1888 = vmatpush3.bf16.msra.mxu0 %v2390_v34 }
 0x18c   :  { %v191_v44 = vcvt.s32.f32 %v189_v43  ;;  %v174_v46 = vcvt.s32.f32 %v172_v45  ;;  %v190_v1 = vcvt.s32.f32 %v188_v62  ;;  %v173_v7 = vcvt.s32.f32 %v171_v2  ;;  %1890 = vmatprep.subr.bf16.mxu0 %v2400_v37 }
 0x18e   :  { %192 = vmin.xlane.f32.xlu1 %v191_v44 }
 0x18f   :  { %1892 = vmatpush3.bf16.msra.mxu0 %v2400_v37 }
 0x192   :  { %175 = vmin.xlane.f32.xlu1 %v174_v46 }
 0x21b   :  { %v193_v63 = vpop.xlane.xlu1 %192 }
 0x21c   :  { %vm194_vm6 = vcmp.eq.f32.partialorder %v191_v44, %v193_v63  ;;  %v199_v38 = vcvt.f32.s32 %v193_v63 }
 0x21d   :  { %v195_v3 = vsel %vm194_vm6, %v190_v1, inf }
 0x21e   :  { %196 = vmin.xlane.f32.xlu1 %v195_v3  ;;  %v200_v40 = vshll.u32 %v199_v38, 16 }
 0x21f   :  { %v176_v6 = vpop.xlane.xlu1 %175 }
 0x220   :  { %vm177_vm7 = vcmp.eq.f32.partialorder %v174_v46, %v176_v6  ;;  %v182_v41 = vcvt.f32.s32 %v176_v6 }
 0x221   :  { %v178_v9 = vsel %vm177_vm7, %v173_v7, inf }
 0x222   :  { %179 = vmin.xlane.f32.xlu1 %v178_v9  ;;  %v183_v45 = vshll.u32 %v182_v41, 16 }
 0x2ab   :  { %v197_v39 = vpop.xlane.xlu1 %196 }
 0x2ac   :  { %v198_v42 = vcvt.f32.s32 %v197_v39  ;;  %v1279_v39 = vld [vmem:[%s2776_s1 + $0x78] sm:$0xff] }
 0x2ae   :  { %v201_v43 = vadd.s32 %v200_v40, %v198_v42  ;;  %v1280_v40 = vld [vmem:[%s2776_s1 + $0x80] sm:$0xff] }
 0x2af   :  { %v180_v44 = vpop.xlane.xlu1 %179  ;;  %v2521_v42 = vld [vmem:[%s2782_s6] sm:$0xf] }
 0x2b0   :  { %vm205_vm8 = vcmp.eq.s32.totalorder %v2271_v28, %v201_v43  ;;  %v181_v46 = vcvt.f32.s32 %v180_v44  ;;  %v2523_v43 = vpack.c.bf16 %v1280_v40, %v1279_v39  ;;  %v1281_v44 = vld [vmem:[%s2776_s1 + $0x88] sm:$0xff] }
 0x2b1   :  { %v1252_v47 = vsel %vm205_vm8, 1.0, %v2134_v4  ;;  %v1270_v40 = vld [vmem:[%s2779_s0 + $0xa8] sm:$0xff] }
 0x2b2   :  { %v184_v48 = vadd.s32 %v183_v45, %v181_v46  ;;  %v209_v49 = vrot.slane %v1252_v47, 3  ;;  %v1282_v45 = vld [vmem:[%s2776_s1 + $0x90] sm:$0xff]  ;;  %v1283_v47 = vld [vmem:[%s2776_s1 + $0x98] sm:$0xff] }
 0x2b3   :  { %v2535_v46 = vpack.c.bf16 %v1282_v45, %v1281_v44  ;;  %v1272_v45 = vld [vmem:[%s2779_s0 + $0xb8] sm:$0xff] }
 0x2b4   :  { %vm202_vm10 = vcmp.eq.s32.totalorder %v2271_v28, %v184_v48  ;;  %v1284_v48 = vld [vmem:[%s2776_s1 + $0xa0] sm:$0xff] }
 0x2b5   :  { %v1251_v51 = vsel %vm202_vm10, 1.0, %v2134_v4 }
 0x2b6   :  { %v212_v53 = vsel %vm211_vm9, %v1251_v51, %v209_v49  ;;  %v1285_v51 = vld [vmem:[%s2776_s1 + $0xa8] sm:$0xff] }
 0x2b7   :  { %1547 = vmatprep.mubr.msk.f32.mxu1 %vm85_vm1, %v212_v53  ;;  %v1286_v53 = vld [vmem:[%s2776_s1 + $0xb0] sm:$0xff] }
 0x2b8   :  { %1548 = vmatmul.mubr.msk.f32.vlgmr.msra.gmra.mrb[0].mxu1 %vm85_vm1, %v209_v49  ;;  %v2547_v49 = vpack.c.bf16 %v1284_v48, %v1283_v47  ;;  %v1273_v47 = vld [vmem:[%s2779_s0 + $0xc0] sm:$0xff] }
 0x2b9   :  { %1908 = vmatpush3.bf16.msra.mxu1 %v2194_v5  ;;  %v38_v5 = vld [vmem:[%s2780_s4 + $0x40] sm:$0xff]  ;;  %v2687_v48 = vpack.c.bf16 %v1273_v47, %v1272_v45 }
 0x2ba   :  { %1910 = vmatprep.subr.bf16.mxu1 %v2200_v8 }
 0x2bd   :  { %1912 = vmatpush3.bf16.msra.mxu1 %v2200_v8  ;;  %v39_v8 = vld [vmem:[%s2780_s4 + $0x48] sm:$0xff] }
 0x2be   :  { %1914 = vmatprep.subr.bf16.mxu1 %v2213_v12 }
 0x2c1   :  { %1916 = vmatpush3.bf16.msra.mxu1 %v2213_v12  ;;  %v2434_v12 = vpack.c.bf16 %v39_v8, %v38_v5  ;;  %v2557_v5 = vpack.c.bf16 %v1286_v53, %v1285_v51  ;;  %v1287_v8 = vld [vmem:[%s2776_s1 + $0xb8] sm:$0xff] }
 0x2c2   :  { %1918 = vmatprep.subr.bf16.mxu1 %v2223_v15 }
 0x2c3   :  { %1894 = vmatprep.subr.bf16.mxu0 %v2434_v12 }
 0x2c4   :  { %1896 = vmatpush3.bf16.msra.mxu0 %v2434_v12 }
 0x2c5   :  { %1920 = vmatpush3.bf16.msra.mxu1 %v2223_v15  ;;  %v40_v15 = vld [vmem:[%s2780_s4 + $0x50] sm:$0xff] }
 0x2c6   :  { %1922 = vmatprep.subr.bf16.mxu1 %v2233_v18 }
 0x2c9   :  { %1924 = vmatpush3.bf16.msra.mxu1 %v2233_v18  ;;  %v41_v18 = vld [vmem:[%s2780_s4 + $0x58] sm:$0xff] }
 0x2ca   :  { %1926 = vmatprep.subr.bf16.mxu1 %v2243_v21 }
 0x2cd   :  { %1928 = vmatpush3.bf16.msra.mxu1 %v2243_v21  ;;  %v2444_v21 = vpack.c.bf16 %v41_v18, %v40_v15  ;;  %v1288_v15 = vld [vmem:[%s2776_s1 + $0xc0] sm:$0xff] }
 0x2ce   :  { %1930 = vmatprep.subr.bf16.mxu1 %v2253_v24  ;;  %v2567_v18 = vpack.c.bf16 %v1288_v15, %v1287_v8 }
 0x2cf   :  { %1898 = vmatprep.subr.bf16.mxu0 %v2444_v21 }
 0x2d0   :  { %1900 = vmatpush3.bf16.msra.mxu0 %v2444_v21 }
 0x2d1   :  { %1932 = vmatpush3.bf16.msra.mxu1 %v2253_v24  ;;  %v42_v24 = vld [vmem:[%s2780_s4 + $0x60] sm:$0xff] }
 0x2d2   :  { %1611 = vmatprep.subr.mxu1 %v2261_v25 }
 0x2d5   :  { %1612 = vmatpush3.msra.mxu1 %v2261_v25  ;;  %v43_v25 = vld [vmem:[%s2780_s4 + $0x68] sm:$0xff] }
 0x2d6   :  { %1961 = vmatprep.subr.bf16.mxu1 %v2132_v0  ;;  %v2452_v54 = vpack.c.bf16 %v43_v25, %v42_v24  ;;  %v1289_v24 = vld [vmem:[%s2776_s1 + $0xc8] sm:$0xff]  ;;  %v1290_v25 = vld [vmem:[%s2776_s1 + $0xd0] sm:$0xff] }
 0x2d8   :  { %1902 = vmatprep.subr.bf16.mxu0 %v2452_v54 }
 0x2d9   :  { %1904 = vmatpush3.bf16.msra.mxu0 %v2452_v54 }
 0x2da   :  { %1578 = vmatprep.subr.mxu0 %v2460_v56 }
 0x2dd   :  { %1579 = vmatpush3.msra.mxu0 %v2460_v56 }
 0x2de   :  { %1934 = vmatprep.subr.bf16.mxu0 %v2296_v50 }
 0x38b   :  { %v1549_v57 = vpop.f32.mrb[0].mxu1 }
 0x38c   :  { %v284_v59 = vpop.f32.mrb[1].mxu1 }
 0x38d   :  { %2108 = vtanh.f32 %v284_v59  ;;  %v1291_v59 = vld [vmem:[%s2776_s1 + $0xd8] sm:$0xff] }
 0x38e   :  { %2110 = vtanh.f32 %v1549_v57  ;;  %v2577_v57 = vpack.c.bf16 %v1290_v25, %v1289_v24 }
 0x397   :  { %v2109_v60 = vpop.eup %2108 }
 0x398   :  { %v2111_v62 = vpop.eup %2110  ;;  %1580 = vmatprep.mubr.msk.f32.mxu0 %vm85_vm1, %v2109_v60  ;;  %v1292_v60 = vld [vmem:[%s2776_s1 + $0xe0] sm:$0xff] }
 0x399   :  { %1581 = vmatmul.mubr.msk.f32.vlgmr.msra.gmra.mrb[2].mxu0 %vm85_vm1, %v2111_v62  ;;  %v2587_v62 = vpack.c.bf16 %v1292_v60, %v1291_v59 }
 0x39a   :  { %1936 = vmatpush3.bf16.msra.mxu0 %v2296_v50  ;;  %v2486_v50 = vld [vmem:[%s2781_s5] ss:$0 sm:$0xff] }
 0x39b   :  { %1938 = vmatprep.subr.bf16.mxu0 %v2301_v52 }
 0x39e   :  { %1940 = vmatpush3.bf16.msra.mxu0 %v2301_v52 }
 0x39f   :  { %1942 = vmatprep.subr.bf16.mxu0 %v2312_v55 }
 0x3a2   :  { %1944 = vmatpush3.bf16.msra.mxu0 %v2312_v55 }
 0x3a3   :  { %1946 = vmatprep.subr.bf16.mxu0 %v2322_v58 }
 0x3a6   :  { %1948 = vmatpush3.bf16.msra.mxu0 %v2322_v58 }
 0x3a7   :  { %1950 = vmatprep.subr.bf16.mxu0 %v2332_v61 }
 0x3aa   :  { %1952 = vmatpush3.bf16.msra.mxu0 %v2332_v61 }
 0x3ab   :  { %1954 = vmatprep.subr.bf16.mxu0 %v2343_v13 }
 0x3ae   :  { %1956 = vmatpush3.bf16.msra.mxu0 %v2343_v13 }
 0x3af   :  { %1958 = vmatprep.subr.bf16.mxu0 %v2353_v17 }
 0x3b2   :  { %1960 = vmatpush3.bf16.msra.mxu0 %v2353_v17 }
 0x3b3   :  { %1644 = vmatprep.subr.mxu0 %v2359_v19 }
 0x3b6   :  { %1645 = vmatpush3.msra.mxu0 %v2359_v19 }
 0x46c   :  { %v1582_v52 = vpop.f32.mrb[2].mxu0 }
 0x46d   :  { %v373_v55 = vpop.f32.mrb[3].mxu0  ;;  %v2492_v61 = vadd.f32 %v1582_v52, %v2486_v50  ;;  %v2595_v52 = vld [vmem:[%s2776_s1 + $0xe8] sm:$0xff] }
 0x46e   :  { %v2489_v58 = vadd.f32 %v2486_v50, %v373_v55 }
 0x470   :  { %1613 = vmatprep.mubr.msk.f32.mxu1 %vm85_vm1, %v2489_v58 }
 0x471   :  { %1614 = vmatmul.mubr.msk.f32.vlgmr.msra.gmra.mrb[2].mxu1 %vm85_vm1, %v2492_v61 }
 0x472   :  { %1653 = vmatprep.mubr.msk.f32.mxu1 %vm2133_vm0, %v2134_v4 }
 0x544   :  { %v1615_v63 = vpop.f32.mrb[2].mxu1 }
 0x545   :  { %v454_v1 = vpop.f32.mrb[3].mxu1  ;;  %v464_v3 = vmul.f32 0.09128709, %v1615_v63 }
 0x546   :  { %v463_v2 = vmul.f32 0.09128709, %v454_v1 }
 0x547   :  { %v469_v7 = vsel %vm468_vm11, %v464_v3, -inf }
 0x548   :  { %v465_v6 = vsel %vm85_vm1, %v463_v2, -inf }
 0x549   :  { %466 = vmax.xlane.f32.xlu1 %v465_v6 }
 0x54d   :  { %470 = vmax.xlane.f32.xlu1 %v469_v7 }
 0x5d6   :  { %v467_v9 = vpop.xlane.xlu1 %466 }
 0x5d7   :  { %v472_v10 = vsub.f32 %v463_v2, %v467_v9 }
 0x5d9   :  { %v474_v11 = vmul.f32 1.442695, %v472_v10 }
 0x5da   :  { %v471_v13 = vpop.xlane.xlu1 %470 }
 0x5db   :  { %2112 = vpow2.f32 %v474_v11  ;;  %v473_v14 = vsub.f32 %v464_v3, %v471_v13 }
 0x5dd   :  { %v476_v16 = vmul.f32 1.442695, %v473_v14 }
 0x5df   :  { %2114 = vpow2.f32 %v476_v16 }
 0x5e5   :  { %v2113_v17 = vpop.eup %2112 }
 0x5e6   :  { %v478_v19 = vsel %vm85_vm1, %v2113_v17, 0.0 }
 0x5e7   :  { %479 = vadd.xlane.f32.xlu1 %v478_v19 }
 0x5e9   :  { %v2115_v20 = vpop.eup %2114 }
 0x5ea   :  { %v481_v22 = vsel %vm468_vm11, %v2115_v20, 0.0 }
 0x5eb   :  { %482 = vadd.xlane.f32.xlu1 %v481_v22  ;;  %v1265_v22 = vld [vmem:[%s2779_s0 + $0x80] sm:$0xff] }
 0x674   :  { %v480_v23 = vpop.xlane.xlu1 %479 }
 0x675   :  { %2116 = vrcp.f32 %v480_v23  ;;  %v1266_v23 = vld [vmem:[%s2779_s0 + $0x88] sm:$0xff] }
 0x678   :  { %v483_v30 = vpop.xlane.xlu1 %482 }
 0x679   :  { %2118 = vrcp.f32 %v483_v30 }
 0x67f   :  { %v2117_v32 = vpop.eup %2116 }
 0x680   :  { %v486_v33 = vmul.f32 %v2117_v32, %v2113_v17  ;;  %v1267_v32 = vld [vmem:[%s2779_s0 + $0x90] sm:$0xff] }
 0x682   :  { %1646 = vmatprep.mubr.msk.f32.mxu0 %vm85_vm1, %v486_v33 }
 0x683   :  { %v2119_v35 = vpop.eup %2118 }
 0x684   :  { %v487_v36 = vmul.f32 %v2119_v35, %v2115_v20  ;;  %v1264_v20 = vld [vmem:[%s2779_s0 + $0x78] sm:$0xff] }
 0x685   :  { %v2650_v30 = vpack.c.bf16 %v1265_v22, %v1264_v20  ;;  %v1268_v35 = vld [vmem:[%s2779_s0 + $0x98] sm:$0xff] }
 0x686   :  { %v1962_v41 = vpack.c.bf16 %v487_v36, %v486_v33  ;;  %1647 = vmatmul.mubr.msk.f32.vlgmr.msra.gmra.mrb[4].mxu0 %vm85_vm1, %v487_v36  ;;  %v2655_v33 = vpack.c.bf16 %v1267_v32, %v1266_v23  ;;  %v1269_v36 = vld [vmem:[%s2779_s0 + $0xa0] sm:$0xff] }
 0x687   :  { %1987 = vmatprep.subr.bf16.mxu0 %v2650_v30  ;;  %v2667_v39 = vpack.c.bf16 %v1269_v36, %v1268_v35 }
 0x688   :  { %1964 = vmatpush3.bf16.msk.msra.mxu1 %vm2505_vm14, %v1962_v41  ;;  %1989 = vmatpush3.bf16.msra.mxu0 %v2650_v30  ;;  %v1271_v41 = vld [vmem:[%s2779_s0 + $0xb0] sm:$0xff] }
 0x689   :  { %1965 = vmatprep.subr.bf16.mxu1 %v2132_v0  ;;  %1991 = vmatprep.subr.bf16.mxu0 %v2655_v33  ;;  %v2677_v44 = vpack.c.bf16 %v1271_v41, %v1270_v40 }
 0x68b   :  { %1654 = vmatmul.mubr.msk.f32.vlgmr.msra.gmra.mrb[4].mxu1 %vm577_vm15, %v2521_v42 }
 0x68c   :  { %1967 = vmatpush3.bf16.msra.mxu1 %v2523_v43  ;;  %1686 = vmatprep.mubr.msk.f32.mxu1 %vm2133_vm0, %v2134_v4 }
 0x68d   :  { %1968 = vmatprep.subr.bf16.mxu1 %v2132_v0  ;;  %1993 = vmatpush3.bf16.msra.mxu0 %v2655_v33 }
 0x68e   :  { %1995 = vmatprep.subr.bf16.mxu0 %v2667_v39 }
 0x690   :  { %1970 = vmatpush3.bf16.msra.mxu1 %v2535_v46 }
 0x691   :  { %1971 = vmatprep.subr.bf16.mxu1 %v2132_v0  ;;  %1997 = vmatpush3.bf16.msra.mxu0 %v2667_v39 }
 0x692   :  { %1999 = vmatprep.subr.bf16.mxu0 %v2677_v44 }
 0x694   :  { %1973 = vmatpush3.bf16.msra.mxu1 %v2547_v49 }
 0x695   :  { %1974 = vmatprep.subr.bf16.mxu1 %v2132_v0  ;;  %2001 = vmatpush3.bf16.msra.mxu0 %v2677_v44 }
 0x696   :  { %2003 = vmatprep.subr.bf16.mxu0 %v2687_v48 }
 0x698   :  { %1976 = vmatpush3.bf16.msra.mxu1 %v2557_v5 }
 0x699   :  { %1977 = vmatprep.subr.bf16.mxu1 %v2132_v0  ;;  %2005 = vmatpush3.bf16.msra.mxu0 %v2687_v48 }
 0x69c   :  { %1979 = vmatpush3.bf16.msra.mxu1 %v2567_v18 }
 0x69d   :  { %1980 = vmatprep.subr.bf16.mxu1 %v2132_v0 }
 0x6a0   :  { %1982 = vmatpush3.bf16.msra.mxu1 %v2577_v57 }
 0x6a1   :  { %1983 = vmatprep.subr.bf16.mxu1 %v2132_v0 }
 0x6a4   :  { %1985 = vmatpush3.bf16.msra.mxu1 %v2587_v62 }
 0x6a5   :  { %1684 = vmatprep.subr.mxu1 %v2134_v4 }
 0x6a8   :  { %1685 = vmatpush3.msra.mxu1 %v2595_v52 }
 0x6a9   :  { %1687 = vmatmul.mubr.msk.f32.vlgmr.msra.gmra.mrb[6].mxu1 %vm85_vm1, %v2266_v26  ;;  %2015 = vmatprep.subr.bf16.mxu1 %v2374_v27 }
 0x6aa   :  { %2017 = vmatpush3.bf16.msra.mxu1 %v2374_v27  ;;  %v572_v27 = vmul.f32 0.1, %v2492_v61 }
 0x6ab   :  { %2019 = vmatprep.subr.bf16.mxu1 %v2379_v31 }
 0x6ae   :  { %2021 = vmatpush3.bf16.msra.mxu1 %v2379_v31 }
 0x6af   :  { %2023 = vmatprep.subr.bf16.mxu1 %v2390_v34 }
 0x6b2   :  { %2025 = vmatpush3.bf16.msra.mxu1 %v2390_v34 }
 0x6b3   :  { %2027 = vmatprep.subr.bf16.mxu1 %v2400_v37 }
 0x6b6   :  { %2029 = vmatpush3.bf16.msra.mxu1 %v2400_v37  ;;  %v571_v37 = vmul.f32 0.1, %v2489_v58 }
 0x6b7   :  { %2031 = vmatprep.subr.bf16.mxu1 %v2434_v12 }
 0x6ba   :  { %2033 = vmatpush3.bf16.msra.mxu1 %v2434_v12 }
 0x6bb   :  { %2035 = vmatprep.subr.bf16.mxu1 %v2444_v21 }
 0x6be   :  { %2037 = vmatpush3.bf16.msra.mxu1 %v2444_v21 }
 0x6bf   :  { %2039 = vmatprep.subr.bf16.mxu1 %v2452_v54 }
 0x6c2   :  { %2041 = vmatpush3.bf16.msra.mxu1 %v2452_v54 }
 0x6c3   :  { %1750 = vmatprep.subr.mxu1 %v2460_v56 }
 0x6c6   :  { %1751 = vmatpush3.msra.mxu1 %v2460_v56 }
 0x6c7   :  { %2071 = vmatprep.subr.bf16.mxu1 %v2650_v30 }
 0x759   :  { %v1648_v26 = vpop.f32.mrb[4].mxu0 }
 0x75a   :  { %v570_v31 = vmul.f32 0.9, %v1648_v26  ;;  %v560_v34 = vpop.f32.mrb[5].mxu0  ;;  %v1274_v26 = vld [vmem:[%s2779_s0 + $0xc8] sm:$0xff] }
 0x75b   :  { %v569_v12 = vmul.f32 0.9, %v560_v34  ;;  %v1276_v34 = vld [vmem:[%s2779_s0 + $0xd8] sm:$0xff] }
 0x75c   :  { %v574_v55 = vadd.f32 %v572_v27, %v570_v31  ;;  %v1275_v27 = vld [vmem:[%s2779_s0 + $0xd0] sm:$0xff] }
 0x75d   :  { %v573_v63 = vadd.f32 %v571_v37, %v569_v12  ;;  %v2698_v31 = vpack.c.bf16 %v1275_v27, %v1274_v26  ;;  %v1277_v37 = vld [vmem:[%s2779_s0 + $0xe0] sm:$0xff] }
 0x75e   :  { %576 = vst.msk [vmem:[%s2783_s7 + $0x8] sm:$0x3] %vm468_vm11, %v574_v55  ;;  %v650_v21 = vpop.f32.mrb[4].mxu1  ;;  %v2010_v12 = vpack.c.bf16 %v1277_v37, %v1276_v34  ;;  %v1278_v55 = vld [vmem:[%s2779_s0 + $0xe8] sm:$0xff] }
 0x75f   :  { %575 = vst.msk [vmem:[%s2783_s7] sm:$0xff] %vm85_vm1, %v573_v63  ;;  %v1655_v54 = vpop.f32.mrb[5].mxu1  ;;  %2007 = vmatprep.subr.bf16.mxu0 %v2698_v31 }
 0x760   :  { %655 = vst.msk [vmem:[%s2784_s8] sm:$0xf] %vm654_vm4, %v650_v21  ;;  %2009 = vmatpush3.bf16.msra.mxu0 %v2698_v31 }
 0x761   :  { %2011 = vmatprep.subr.bf16.mxu0 %v2010_v12 }
 0x764   :  { %2013 = vmatpush3.bf16.msra.mxu0 %v2010_v12 }
 0x765   :  { %1717 = vmatprep.subr.mxu0 %v1278_v55 }
 0x768   :  { %1718 = vmatpush3.msra.mxu0 %v1278_v55 }
 0x769   :  { %2043 = vmatprep.subr.bf16.mxu0 %v2523_v43 }
 0x77c   :  { %v754_v56 = vpop.f32.mrb[6].mxu1 }
 0x77d   :  { %v755_v58 = vadd.f32 %v754_v56, %v2273_v29  ;;  %v1688_v61 = vpop.f32.mrb[7].mxu1 }
 0x77f   :  { %v759_v1 = vsel %vm49_vm2, -inf, %v755_v58  ;;  %v758_v2 = vsel %vm49_vm2, %v755_v58, -inf }
 0x780   :  { %v763_v3 = vsel %vm161_vm3, %v759_v1, -inf  ;;  %v760_v6 = vsel %vm161_vm3, %v758_v2, -inf }
 0x781   :  { %764 = vmax.xlane.f32.xlu0 %v763_v3  ;;  %761 = vmax.xlane.f32.xlu1 %v760_v6 }
 0x80e   :  { %v765_v7 = vpop.xlane.xlu0 %764  ;;  %v762_v9 = vpop.xlane.xlu1 %761 }
 0x80f   :  { %vm783_vm5 = vcmp.eq.f32.partialorder %v759_v1, %v765_v7  ;;  %vm766_vm6 = vcmp.eq.f32.partialorder %v758_v2, %v762_v9 }
 0x810   :  { %v784_v10 = vsel %vm783_vm5, %v2271_v28, 120  ;;  %v767_v29 = vsel %vm766_vm6, %v2271_v28, 120 }
 0x811   :  { %v785_v11 = vsel %vm161_vm3, %v784_v10, 2147483647  ;;  %v768_v13 = vsel %vm161_vm3, %v767_v29, 2147483647 }
 0x812   :  { %v787_v14 = vshra.s32 %v785_v11, 16  ;;  %v770_v16 = vshra.s32 %v768_v13, 16  ;;  %v786_v51 = vand.u32 65535, %v785_v11  ;;  %v769_v53 = vand.u32 65535, %v768_v13 }
 0x814   :  { %v789_v17 = vcvt.s32.f32 %v787_v14  ;;  %v772_v19 = vcvt.s32.f32 %v770_v16  ;;  %v788_v24 = vcvt.s32.f32 %v786_v51  ;;  %v771_v25 = vcvt.s32.f32 %v769_v53 }
 0x816   :  { %790 = vmin.xlane.f32.xlu0 %v789_v17  ;;  %773 = vmin.xlane.f32.xlu1 %v772_v19 }
 0x8a3   :  { %v791_v8 = vpop.xlane.xlu0 %790  ;;  %v774_v15 = vpop.xlane.xlu1 %773 }
 0x8a4   :  { %vm792_vm2 = vcmp.eq.f32.partialorder %v789_v17, %v791_v8  ;;  %vm775_vm3 = vcmp.eq.f32.partialorder %v772_v19, %v774_v15  ;;  %v797_v63 = vcvt.f32.s32 %v791_v8  ;;  %v780_v21 = vcvt.f32.s32 %v774_v15 }
 0x8a5   :  { %v793_v59 = vsel %vm792_vm2, %v788_v24, inf  ;;  %v776_v60 = vsel %vm775_vm3, %v771_v25, inf }
 0x8a6   :  { %794 = vmin.xlane.f32.xlu0 %v793_v59  ;;  %777 = vmin.xlane.f32.xlu1 %v776_v60  ;;  %v798_v58 = vshll.u32 %v797_v63, 16  ;;  %v781_v61 = vshll.u32 %v780_v21, 16 }
 0x933   :  { %v795_v54 = vpop.xlane.xlu0 %794  ;;  %v778_v56 = vpop.xlane.xlu1 %777 }
 0x934   :  { %v796_v1 = vcvt.f32.s32 %v795_v54  ;;  %v779_v2 = vcvt.f32.s32 %v778_v56 }
 0x936   :  { %v799_v3 = vadd.s32 %v798_v58, %v796_v1  ;;  %v782_v6 = vadd.s32 %v781_v61, %v779_v2 }
 0x938   :  { %vm803_vm7 = vcmp.eq.s32.totalorder %v2271_v28, %v799_v3  ;;  %vm800_vm8 = vcmp.eq.s32.totalorder %v2271_v28, %v782_v6 }
 0x939   :  { %v1296_v7 = vsel %vm803_vm7, 1.0, %v2134_v4  ;;  %v1295_v10 = vsel %vm800_vm8, 1.0, %v2134_v4 }
 0x93a   :  { %v807_v9 = vrot.slane %v1296_v7, 3 }
 0x93c   :  { %v809_v29 = vsel %vm211_vm9, %v1295_v10, %v807_v9 }
 0x93d   :  { %1719 = vmatprep.mubr.msk.f32.mxu0 %vm85_vm1, %v809_v29 }
 0x93e   :  { %1720 = vmatmul.mubr.msk.f32.vlgmr.msra.gmra.mrb[6].mxu0 %vm85_vm1, %v807_v9 }
 0x93f   :  { %2045 = vmatpush3.bf16.msra.mxu0 %v2523_v43 }
 0x940   :  { %2047 = vmatprep.subr.bf16.mxu0 %v2535_v46 }
 0x943   :  { %2049 = vmatpush3.bf16.msra.mxu0 %v2535_v46 }
 0x944   :  { %2051 = vmatprep.subr.bf16.mxu0 %v2547_v49 }
 0x947   :  { %2053 = vmatpush3.bf16.msra.mxu0 %v2547_v49 }
 0x948   :  { %2055 = vmatprep.subr.bf16.mxu0 %v2557_v5 }
 0x94b   :  { %2057 = vmatpush3.bf16.msra.mxu0 %v2557_v5 }
 0x94c   :  { %2059 = vmatprep.subr.bf16.mxu0 %v2567_v18 }
 0x94f   :  { %2061 = vmatpush3.bf16.msra.mxu0 %v2567_v18 }
 0x950   :  { %2063 = vmatprep.subr.bf16.mxu0 %v2577_v57 }
 0x953   :  { %2065 = vmatpush3.bf16.msra.mxu0 %v2577_v57 }
 0x954   :  { %2067 = vmatprep.subr.bf16.mxu0 %v2587_v62 }
 0x957   :  { %2069 = vmatpush3.bf16.msra.mxu0 %v2587_v62 }
 0x958   :  { %1783 = vmatprep.subr.mxu0 %v2595_v52 }
 0x95b   :  { %1784 = vmatpush3.msra.mxu0 %v2595_v52 }
 0x95c   :  { %2098 = vmatprep.subr.bf16.mxu0 %v2132_v0 }
 0xa11   :  { %v1721_v28 = vpop.f32.mrb[6].mxu0 }
 0xa12   :  { %v881_v43 = vpop.f32.mrb[7].mxu0 }
 0xa13   :  { %2120 = vtanh.f32 %v881_v43 }
 0xa14   :  { %2122 = vtanh.f32 %v1721_v28 }
 0xa1d   :  { %v2121_v46 = vpop.eup %2120 }
 0xa1e   :  { %v2123_v49 = vpop.eup %2122  ;;  %1752 = vmatprep.mubr.msk.f32.mxu1 %vm85_vm1, %v2121_v46 }
 0xa1f   :  { %1753 = vmatmul.mubr.msk.f32.vlgmr.msra.gmra.mrb[8].mxu1 %vm85_vm1, %v2123_v49 }
 0xa20   :  { %2073 = vmatpush3.bf16.msra.mxu1 %v2650_v30 }
 0xa21   :  { %2075 = vmatprep.subr.bf16.mxu1 %v2655_v33 }
 0xa24   :  { %2077 = vmatpush3.bf16.msra.mxu1 %v2655_v33 }
 0xa25   :  { %2079 = vmatprep.subr.bf16.mxu1 %v2667_v39 }
 0xa28   :  { %2081 = vmatpush3.bf16.msra.mxu1 %v2667_v39 }
 0xa29   :  { %2083 = vmatprep.subr.bf16.mxu1 %v2677_v44 }
 0xa2c   :  { %2085 = vmatpush3.bf16.msra.mxu1 %v2677_v44 }
 0xa2d   :  { %2087 = vmatprep.subr.bf16.mxu1 %v2687_v48 }
 0xa30   :  { %2089 = vmatpush3.bf16.msra.mxu1 %v2687_v48 }
 0xa31   :  { %2091 = vmatprep.subr.bf16.mxu1 %v2698_v31 }
 0xa34   :  { %2093 = vmatpush3.bf16.msra.mxu1 %v2698_v31 }
 0xa35   :  { %2095 = vmatprep.subr.bf16.mxu1 %v2010_v12 }
 0xa38   :  { %2097 = vmatpush3.bf16.msra.mxu1 %v2010_v12 }
 0xa39   :  { %1816 = vmatprep.subr.mxu1 %v1278_v55 }
 0xa3c   :  { %1817 = vmatpush3.msra.mxu1 %v1278_v55 }
 0xaf2   :  { %v1754_v0 = vpop.f32.mrb[8].mxu1 }
 0xaf3   :  { %v964_v5 = vpop.f32.mrb[9].mxu1  ;;  %v970_v57 = vadd.f32 %v1754_v0, %v2486_v50 }
 0xaf4   :  { %v965_v18 = vadd.f32 %v2486_v50, %v964_v5 }
 0xaf5   :  { %v1162_v48 = vmul.f32 0.1, %v970_v57 }
 0xaf6   :  { %1785 = vmatprep.mubr.msk.f32.mxu0 %vm85_vm1, %v965_v18  ;;  %v1161_v8 = vmul.f32 0.1, %v965_v18 }
 0xaf7   :  { %1786 = vmatmul.mubr.msk.f32.vlgmr.msra.gmra.mrb[8].mxu0 %vm85_vm1, %v970_v57 }
 0xaf8   :  { %1825 = vmatprep.mubr.msk.f32.mxu0 %vm2133_vm0, %v2134_v4 }
 0xbca   :  { %v1787_v62 = vpop.f32.mrb[8].mxu0 }
 0xbcb   :  { %v1055_v52 = vmul.f32 0.09128709, %v1787_v62  ;;  %v1045_v11 = vpop.f32.mrb[9].mxu0 }
 0xbcc   :  { %v1054_v13 = vmul.f32 0.09128709, %v1045_v11 }
 0xbcd   :  { %v1059_v14 = vsel %vm468_vm11, %v1055_v52, -inf }
 0xbce   :  { %1060 = vmax.xlane.f32.xlu1 %v1059_v14  ;;  %v1056_v16 = vsel %vm85_vm1, %v1054_v13, -inf }
 0xbcf   :  { %1057 = vmax.xlane.f32.xlu0 %v1056_v16 }
 0xc5b   :  { %v1061_v17 = vpop.xlane.xlu1 %1060 }
 0xc5c   :  { %v1063_v19 = vsub.f32 %v1055_v52, %v1061_v17  ;;  %v1058_v50 = vpop.xlane.xlu0 %1057 }
 0xc5d   :  { %v1062_v20 = vsub.f32 %v1054_v13, %v1058_v50 }
 0xc5e   :  { %v1066_v22 = vmul.f32 1.442695, %v1063_v19 }
 0xc5f   :  { %v1064_v23 = vmul.f32 1.442695, %v1062_v20 }
 0xc60   :  { %2124 = vpow2.f32 %v1066_v22 }
 0xc61   :  { %2126 = vpow2.f32 %v1064_v23 }
 0xc6a   :  { %v2125_v30 = vpop.eup %2124 }
 0xc6b   :  { %v2127_v4 = vpop.eup %2126  ;;  %v1071_v32 = vsel %vm468_vm11, %v2125_v30, 0.0 }
 0xc6c   :  { %1072 = vadd.xlane.f32.xlu1 %v1071_v32  ;;  %v1068_v33 = vsel %vm85_vm1, %v2127_v4, 0.0 }
 0xc6d   :  { %1069 = vadd.xlane.f32.xlu0 %v1068_v33 }
 0xcf9   :  { %v1073_v35 = vpop.xlane.xlu1 %1072 }
 0xcfa   :  { %2128 = vrcp.f32 %v1073_v35  ;;  %v1070_v36 = vpop.xlane.xlu0 %1069 }
 0xcfb   :  { %2130 = vrcp.f32 %v1070_v36 }
 0xd04   :  { %v2129_v39 = vpop.eup %2128 }
 0xd05   :  { %v2131_v40 = vpop.eup %2130  ;;  %v1077_v41 = vmul.f32 %v2129_v39, %v2125_v30 }
 0xd06   :  { %v1076_v44 = vmul.f32 %v2131_v40, %v2127_v4 }
 0xd08   :  { %1818 = vmatprep.mubr.msk.f32.mxu1 %vm85_vm1, %v1076_v44  ;;  %v2099_v45 = vpack.c.bf16 %v1077_v41, %v1076_v44 }
 0xd09   :  { %1819 = vmatmul.mubr.msk.f32.vlgmr.msra.gmra.mrb[10].mxu1 %vm85_vm1, %v1077_v41 }
 0xd0a   :  { %2101 = vmatpush3.bf16.msk.msra.mxu0 %vm2505_vm14, %v2099_v45 }
 0xd0d   :  { %1826 = vmatmul.mubr.msk.f32.vlgmr.msra.gmra.mrb[10].mxu0 %vm577_vm15, %v2521_v42 }
 0xddc   :  { %v1820_v47 = vpop.f32.mrb[10].mxu1 }
 0xddd   :  { %v1160_v51 = vmul.f32 0.9, %v1820_v47  ;;  %v1150_v53 = vpop.f32.mrb[11].mxu1 }
 0xdde   :  { %v1159_v15 = vmul.f32 0.9, %v1150_v53 }
 0xddf   :  { %v1164_v24 = vadd.f32 %v1162_v48, %v1160_v51 }
 0xde0   :  { %v1163_v25 = vadd.f32 %v1161_v8, %v1159_v15  ;;  %v1236_v59 = vpop.f32.mrb[10].mxu0 }
 0xde1   :  { %1306 = vst.msk [vmem:[%s2783_s7 + $0x18] sm:$0x3] %vm468_vm11, %v1164_v24  ;;  %v1827_v38 = vpop.f32.mrb[11].mxu0 }
 0xde2   :  { %1309 = vst.msk [vmem:[%s2784_s8 + $0x4] sm:$0xf] %vm654_vm4, %v1236_v59 }
 0xde3   :  { %1305 = vst.msk [vmem:[%s2783_s7 + $0x10] sm:$0xff] %vm85_vm1, %v1163_v25 }

</bundles_post_ra>
